<compile_context>
chip_gen: v7x
topology: tpu7x:2x2x1
jax: 0.10.0
libtpu: 0.0.40
codegen_flags: <defaults>
</compile_context>

<pallas_src>
import jax
import jax.numpy as jnp
from jax import lax
from jax.experimental import pallas as pl
from jax.experimental.pallas import tpu as pltpu


def _round_up(v: int, m: int) -> int:
    return (v + m - 1) // m * m


def f1_kernel(x_ref, w0_ref, b0_ref, w1_ref, b1_ref, o_ref):
    # Layer 0: (tn, d) . (h_pad, d)^T -> (tn, h_pad), f32 accumulation on MXU.
    hidden = lax.dot_general(
        x_ref[...], w0_ref[...],
        dimension_numbers=(((1,), (1,)), ((), ())),
        preferred_element_type=jnp.float32,
    )
    hidden = jnp.maximum(hidden + b0_ref[...], 0.0)  # bias + ReLU in f32 (VPU)
    # Layer 1: (tn, h_pad) . (k_pad, h_pad)^T -> (tn, k_pad).
    out = lax.dot_general(
        hidden.astype(jnp.bfloat16), w1_ref[...],
        dimension_numbers=(((1,), (1,)), ((), ())),
        preferred_element_type=jnp.float32,
    )
    o_ref[...] = out + b1_ref[...]


def f1_forward(x, w0, b0, w1, b1, *, block_rows: int = 512):
    """Pallas equivalent of F1.forward: relu(x @ w0.T + b0) @ w1.T + b1.

    Args:
      x:  (n, d) float32
      w0: (h, d) float32, b0: (h,) float32
      w1: (k, h) float32, b1: (k,) float32
    Returns:
      (n, k) float32
    """
    n, d = x.shape
    h, _ = w0.shape
    k, _ = w1.shape

    # Lane-dense padding of the two matmul output dims.
    h_pad = _round_up(h, 128)
    k_pad = _round_up(k, 128)
    # NOTE: in a real model these padded/bf16 params would be prepared once,
    # not per call; at these shapes the per-call prep cost is noise.
    w0_p = jnp.pad(w0, ((0, h_pad - h), (0, 0))).astype(jnp.bfloat16)           # (h_pad, d)
    b0_p = jnp.pad(b0, (0, h_pad - h)).reshape(1, h_pad).astype(jnp.float32)     # (1, h_pad)
    w1_p = jnp.pad(w1, ((0, k_pad - k), (0, h_pad - h))).astype(jnp.bfloat16)    # (k_pad, h_pad)
    b1_p = jnp.pad(b1, (0, k_pad - k)).reshape(1, k_pad).astype(jnp.float32)     # (1, k_pad)
    x_bf = x.astype(jnp.bfloat16)

    # Batch tile: large enough to amortize the ~0.35us/step overhead, multiple of 8.
    tn = min(block_rows, _round_up(n, 8))
    grid = (pl.cdiv(n, tn),)

    # Rough VMEM budget: resident weights + double-buffered x/out tiles +
    # hidden intermediate, clamped to v7x's 64 MiB physical VMEM.
    # TODO(synk): for very large d/h (e.g. 4096x4096 f32-scale weights) add a
    # contraction grid axis over h with a pl.when-initialized f32 accumulator.
    weight_bytes = 2 * (w0_p.size + w1_p.size) + 4 * (b0_p.size + b1_p.size)
    tile_bytes = 2 * (tn * d * 2) + 2 * (tn * k_pad * 4) + tn * h_pad * (4 + 2)
    vmem_limit = int(min(max(2 * (weight_bytes + tile_bytes), 8 << 20), 64 << 20))

    cost = pl.CostEstimate(
        flops=2 * n * d * h_pad + 2 * n * h_pad * k_pad,
        transcendentals=0,
        bytes_accessed=int(
            x_bf.size * 2
            + 2 * (w0_p.size + w1_p.size)
            + 4 * (b0_p.size + b1_p.size)
            + n * k_pad * 4
        ),
    )

    out_padded = pl.pallas_call(
        f1_kernel,
        out_shape=jax.ShapeDtypeStruct((n, k_pad), jnp.float32),
        grid=grid,
        in_specs=[
            pl.BlockSpec((tn, d), lambda i: (i, 0)),          # x tile (streamed)
            pl.BlockSpec((h_pad, d), lambda i: (0, 0)),       # W0 (VMEM-resident)
            pl.BlockSpec((1, h_pad), lambda i: (0, 0)),       # b0 (VMEM-resident)
            pl.BlockSpec((k_pad, h_pad), lambda i: (0, 0)),   # W1 (VMEM-resident)
            pl.BlockSpec((1, k_pad), lambda i: (0, 0)),       # b1 (VMEM-resident)
        ],
        out_specs=pl.BlockSpec((tn, k_pad), lambda i: (i, 0)),
        compiler_params=pltpu.CompilerParams(
            dimension_semantics=("parallel",),
            vmem_limit_bytes=vmem_limit,
        ),
        cost_estimate=cost,
    )(x_bf, w0_p, b0_p, w1_p, b1_p)

    return out_padded[:, :k]


if __name__ == "__main__":
    # Small shapes consistent with F1(h, d, k): n=8 samples, d=32 features,
    # h=64 hidden units, k=16 classes.
    n, d, h, k = 8, 32, 64, 16

    key = jax.random.PRNGKey(0)
    kx, k0, k1, k2, k3 = jax.random.split(key, 5)

    bound = 1.0 / (float(d) ** 0.5)
    x = jax.random.normal(kx, (n, d), dtype=jnp.float32)
    w0 = jax.random.uniform(k0, (h, d), minval=-bound, maxval=bound, dtype=jnp.float32)
    w1 = jax.random.uniform(k1, (k, h), minval=-bound, maxval=bound, dtype=jnp.float32)
    b0 = jax.random.uniform(k2, (h,), minval=-bound, maxval=bound, dtype=jnp.float32)
    b1 = jax.random.uniform(k3, (k,), minval=-bound, maxval=bound, dtype=jnp.float32)

    y = f1_forward(x, w0, b0, w1, b1)
    jax.block_until_ready(y)
    assert y.shape == (n, k)

    # Tight check against a reference with the same bf16 operand quantization.
    def q(a):
        return a.astype(jnp.bfloat16).astype(jnp.float32)

    hid = jnp.maximum(q(x) @ q(w0).T + b0, 0.0)
    y_bf16_ref = q(hid) @ q(w1).T + b1
    assert jnp.allclose(y, y_bf16_ref, atol=1e-3, rtol=1e-3)

    # Loose check against the exact f32 PyTorch-equivalent forward.
    y_f32_ref = jnp.maximum(x @ w0.T + b0, 0.0) @ w1.T + b1
    assert jnp.allclose(y, y_f32_ref, atol=5e-2, rtol=5e-2)

    print("KERNEL_OK")
</pallas_src>

<mosaic_0001>
module attributes {stable_mosaic.version = 11 : i64} {
  func.func @f1_kernel(%arg0: i32, %arg1: memref<8x32xbf16, #tpu.memory_space<vmem>>, %arg2: memref<128x32xbf16, #tpu.memory_space<vmem>>, %arg3: memref<1x128xf32, #tpu.memory_space<vmem>>, %arg4: memref<128x128xbf16, #tpu.memory_space<vmem>>, %arg5: memref<1x128xf32, #tpu.memory_space<vmem>>, %arg6: memref<8x128xf32, #tpu.memory_space<vmem>>) attributes {dimension_semantics = [#tpu.dimension_semantics<parallel>], iteration_bounds = array<i64: 1>, scalar_prefetch = 0 : i64, scratch_operands = 0 : i64, tpu.core_type = #tpu.core_type<tc>, window_params = [{transform_indices = @transform_0, window_bounds = array<i64: 8, 32>}, {pipeline_mode = #tpu.pipeline_mode<synchronous>, transform_indices = @transform_1, window_bounds = array<i64: 128, 32>}, {pipeline_mode = #tpu.pipeline_mode<synchronous>, transform_indices = @transform_2, window_bounds = array<i64: 1, 128>}, {pipeline_mode = #tpu.pipeline_mode<synchronous>, transform_indices = @transform_3, window_bounds = array<i64: 128, 128>}, {pipeline_mode = #tpu.pipeline_mode<synchronous>, transform_indices = @transform_4, window_bounds = array<i64: 1, 128>}, {transform_indices = @transform_5, window_bounds = array<i64: 8, 128>}]} {
    %c0 = arith.constant 0 : index
    %c0_0 = arith.constant 0 : index
    %0 = vector.load %arg1[%c0, %c0_0] : memref<8x32xbf16, #tpu.memory_space<vmem>>, vector<8x32xbf16>
    %c0_1 = arith.constant 0 : index
    %c0_2 = arith.constant 0 : index
    %1 = vector.load %arg2[%c0_1, %c0_2] : memref<128x32xbf16, #tpu.memory_space<vmem>>, vector<128x32xbf16>
    %cst = arith.constant dense<0.000000e+00> : vector<8x128xf32>
    %2 = tpu.matmul %0, %1, %cst {dimension_numbers = #tpu.dot_dimension_numbers<[1], [1], [0], [0], [0, 0, 1, 0], [], []>} : vector<8x32xbf16>, vector<128x32xbf16>, vector<8x128xf32> -> vector<8x128xf32>
    %c0_3 = arith.constant 0 : index
    %c0_4 = arith.constant 0 : index
    %3 = vector.load %arg3[%c0_3, %c0_4] : memref<1x128xf32, #tpu.memory_space<vmem>>, vector<1x128xf32>
    %4 = vector.broadcast %3 : vector<1x128xf32> to vector<8x128xf32>
    %5 = arith.addf %2, %4 : vector<8x128xf32>
    %cst_5 = arith.constant 0.000000e+00 : f32
    %6 = vector.broadcast %cst_5 : f32 to vector<8x128xf32>
    %7 = arith.maximumf %5, %6 : vector<8x128xf32>
    %8 = arith.truncf %7 : vector<8x128xf32> to vector<8x128xbf16>
    %c0_6 = arith.constant 0 : index
    %c0_7 = arith.constant 0 : index
    %9 = vector.load %arg4[%c0_6, %c0_7] : memref<128x128xbf16, #tpu.memory_space<vmem>>, vector<128x128xbf16>
    %cst_8 = arith.constant dense<0.000000e+00> : vector<8x128xf32>
    %10 = tpu.matmul %8, %9, %cst_8 {dimension_numbers = #tpu.dot_dimension_numbers<[1], [1], [0], [0], [0, 0, 1, 0], [], []>} : vector<8x128xbf16>, vector<128x128xbf16>, vector<8x128xf32> -> vector<8x128xf32>
    %c0_9 = arith.constant 0 : index
    %c0_10 = arith.constant 0 : index
    %11 = vector.load %arg5[%c0_9, %c0_10] : memref<1x128xf32, #tpu.memory_space<vmem>>, vector<1x128xf32>
    %12 = vector.broadcast %11 : vector<1x128xf32> to vector<8x128xf32>
    %13 = arith.addf %10, %12 : vector<8x128xf32>
    %c0_11 = arith.constant 0 : index
    %c0_12 = arith.constant 0 : index
    %14 = vector.load %arg6[%c0_11, %c0_12] : memref<8x128xf32, #tpu.memory_space<vmem>>, vector<8x128xf32>
    tpu.vector_store %arg6[%c0_11, %c0_12], %13 {strides = array<i32>} : memref<8x128xf32, #tpu.memory_space<vmem>>, vector<8x128xf32>,
    return
  }
  func.func @transform_0(%arg0: i32) -> (i32, i32) {
    %c0_i32 = arith.constant 0 : i32
    %c0_i32_0 = arith.constant 0 : i32
    return %arg0, %c0_i32 : i32, i32
  }
  func.func @transform_1(%arg0: i32) -> (i32, i32) {
    %c0_i32 = arith.constant 0 : i32
    %c0_i32_0 = arith.constant 0 : i32
    %c0_i32_1 = arith.constant 0 : i32
    return %c0_i32, %c0_i32_0 : i32, i32
  }
  func.func @transform_2(%arg0: i32) -> (i32, i32) {
    %c0_i32 = arith.constant 0 : i32
    %c0_i32_0 = arith.constant 0 : i32
    %c0_i32_1 = arith.constant 0 : i32
    return %c0_i32, %c0_i32_0 : i32, i32
  }
  func.func @transform_3(%arg0: i32) -> (i32, i32) {
    %c0_i32 = arith.constant 0 : i32
    %c0_i32_0 = arith.constant 0 : i32
    %c0_i32_1 = arith.constant 0 : i32
    return %c0_i32, %c0_i32_0 : i32, i32
  }
  func.func @transform_4(%arg0: i32) -> (i32, i32) {
    %c0_i32 = arith.constant 0 : i32
    %c0_i32_0 = arith.constant 0 : i32
    %c0_i32_1 = arith.constant 0 : i32
    return %c0_i32, %c0_i32_0 : i32, i32
  }
  func.func @transform_5(%arg0: i32) -> (i32, i32) {
    %c0_i32 = arith.constant 0 : i32
    %c0_i32_0 = arith.constant 0 : i32
    return %arg0, %c0_i32 : i32, i32
  }
}

</mosaic_0001>

<bundles_post_ra>
// kernel: tpu_custom_call.1
= control target key start
LH: loop header
LB: loop body
LE: loop exit
PB: predicated region body
PF: predicated region fallthrough
CT: control target
= control target key end

     0   :  { %v402_v1 = vmov 0.0   ;;  %vm86_vm0 = vcmask 261120   ;;  %vm403_vm1 = vmmov 0   ;;  %s513_s0 = inlined_call_operand.vmem [shape: bf16[8,32], index: 0, kind: input, shape index: {}]   ;;  %s514_s1 = inlined_call_operand.vmem [shape: bf16[128,32], index: 1, kind: input, shape index: {}]   ;;  %s515_s2 = inlined_call_operand.vmem [shape: f32[1,128], index: 2, kind: input, shape index: {}]   ;;  %s516_s3 = inlined_call_operand.vmem [shape: bf16[128,128], index: 3, kind: input, shape index: {}]   ;;  %s517_s4 = inlined_call_operand.vmem [shape: f32[1,128], index: 4, kind: input, shape index: {}]   ;;  %s518_s5 = inlined_call_operand.hbm [shape: f32[8,128], index: 5, kind: output, shape index: {}]  }
   0x1   :  { %v362_v0 = vld [vmem:[%s514_s1] sm:$0xff]   ;;  %319 = vmatprep.subr.bf16.mxu0 %v402_v1  ;;  %339 = vmatprep.subr.bf16.mxu1 %v402_v1  ;;  %v363_v3 = vld [vmem:[%s514_s1 + $0x8] sm:$0xff]   ;;  %v364_v6 = vld [vmem:[%s514_s1 + $0x10] sm:$0xff]  }
   0x2   :  { %v91_v2 = vsel %vm86_vm0, %v362_v0, 0  ;;  %v94_v4 = vsel %vm86_vm0, %v363_v3, 0  ;;  %335 = vmatprep.mubr.msk.bf16.mxu0 %vm403_vm1, %v402_v1  ;;  %v370_v5 = vld [vmem:[%s516_s3] sm:$0xff]   ;;  %355 = vmatprep.mubr.msk.bf16.mxu1 %vm403_vm1, %v402_v1  ;;  %v97_v7 = vsel %vm86_vm0, %v364_v6, 0  ;;  %v371_v8 = vld [vmem:[%s516_s3 + $0x8] sm:$0xff]  }
   0x3   :  { %320 = vmatpush3.bf16.xpose.msra.mxu0 %v91_v2  ;;  %340 = vmatpush3.bf16.xpose.msra.mxu1 %v370_v5 }
   0x4   :  { %321 = vmatprep.subr.bf16.mxu0 %v402_v1  ;;  %341 = vmatprep.subr.bf16.mxu1 %v402_v1 }
   0xb   :  { %322 = vmatpush3.bf16.xpose.msra.mxu0 %v94_v4 }
   0xc   :  { %323 = vmatprep.subr.bf16.mxu0 %v402_v1 }
   0xd   :  { %10 = vsyncpa [#allocation3], 0  ;;  %342 = vmatpush3.bf16.xpose.msra.mxu1 %v371_v8  ;;  %v365_v9 = vld [vmem:[%s514_s1 + $0x18] sm:$0xff]   ;;  %v372_v10 = vld [vmem:[%s516_s3 + $0x10] sm:$0xff]   ;;  %s404_s29 = smov [#allocation2]  }
   0xe   :  { %343 = vmatprep.subr.bf16.mxu1 %v402_v1  ;;  %v100_v11 = vsel %vm86_vm0, %v365_v9, 0  ;;  %v366_v12 = vld [vmem:[%s514_s1 + $0x20] sm:$0xff]   ;;  %v373_v13 = vld [vmem:[%s516_s3 + $0x18] sm:$0xff]   ;;  %v367_v15 = vld [vmem:[%s514_s1 + $0x28] sm:$0xff]   ;;  %s274_s30 = sshll.u32 %s404_s29, 4  ;;  %s275_s30 = int_to_ptr.vmem [resolvable:$true] %s274_s30 }
   0xf   :  { %v103_v14 = vsel %vm86_vm0, %v366_v12, 0  ;;  %v374_v16 = vld [vmem:[%s516_s3 + $0x20] sm:$0xff]   ;;  %v106_v17 = vsel %vm86_vm0, %v367_v15, 0  ;;  %v368_v18 = vld [vmem:[%s514_s1 + $0x30] sm:$0xff]   ;;  %v375_v19 = vld [vmem:[%s516_s3 + $0x28] sm:$0xff]   ;;  %p383_p1 = scmp.lt.s32.totalorder %s275_s30, %s275_s30 }
  0x10   :  { %v109_v20 = vsel %vm86_vm0, %v368_v18, 0  ;;  %v369_v21 = vld [vmem:[%s514_s1 + $0x38] sm:$0xff]   ;;  %v376_v22 = vld [vmem:[%s516_s3 + $0x30] sm:$0xff]   ;;  %v22_v24 = vld [vmem:[%s513_s0] sm:$0xf] }
  0x11   :  { %v112_v23 = vsel %vm86_vm0, %v369_v21, 0  ;;  %v377_v25 = vld [vmem:[%s516_s3 + $0x38] sm:$0xff]   ;;  %v282_v26 = vld [vmem:[%s515_s2] ss:$0 sm:$0xff]  ;;  %s378_s2 = scalar_lea.vmem %s275_s30, 128 }
  0x12   :  { %v292_v34 = vld [vmem:[%s517_s4] ss:$0 sm:$0xff]  ;;  %p379_p0 = scmp.ne.s32.totalorder %s275_s30, %s378_s2  ;;  %p384_p2 = scmp.lt.s32.totalorder %s378_s2, %s378_s2 }
  0x13   :  { %324 = vmatpush3.bf16.xpose.msra.mxu0 %v97_v7 }
  0x14   :  { %325 = vmatprep.subr.bf16.mxu0 %v402_v1  ;;  %p385_p3 = por %p384_p2, %p383_p1 }
  0x15   :  { %344 = vmatpush3.bf16.xpose.msra.mxu1 %v372_v10 }
  0x16   :  { %345 = vmatprep.subr.bf16.mxu1 %v402_v1  ;;  %p386_p4 = pnand %p385_p3, %p379_p0 }
  0x1b   :  { %326 = vmatpush3.bf16.xpose.msra.mxu0 %v100_v11 }
  0x1c   :  { %327 = vmatprep.subr.bf16.mxu0 %v402_v1 }
  0x1d   :  { %346 = vmatpush3.bf16.xpose.msra.mxu1 %v373_v13 }
  0x1e   :  { %347 = vmatprep.subr.bf16.mxu1 %v402_v1 }
  0x23   :  { %328 = vmatpush3.bf16.xpose.msra.mxu0 %v103_v14 }
  0x24   :  { %329 = vmatprep.subr.bf16.mxu0 %v402_v1 }
  0x25   :  { %348 = vmatpush3.bf16.xpose.msra.mxu1 %v374_v16 }
  0x26   :  { %349 = vmatprep.subr.bf16.mxu1 %v402_v1 }
  0x2b   :  { %330 = vmatpush3.bf16.xpose.msra.mxu0 %v106_v17 }
  0x2c   :  { %331 = vmatprep.subr.bf16.mxu0 %v402_v1 }
  0x2d   :  { %350 = vmatpush3.bf16.xpose.msra.mxu1 %v375_v19 }
  0x2e   :  { %351 = vmatprep.subr.bf16.mxu1 %v402_v1 }
  0x33   :  { %332 = vmatpush3.bf16.xpose.msra.mxu0 %v109_v20 }
  0x34   :  { %333 = vmatprep.subr.bf16.mxu0 %v402_v1 }
  0x35   :  { %352 = vmatpush3.bf16.xpose.msra.mxu1 %v376_v22 }
  0x36   :  { %353 = vmatprep.subr.bf16.mxu1 %v402_v1 }
  0x3b   :  { %334 = vmatpush3.bf16.xpose.msra.mxu0 %v112_v23 }
  0x3d   :  { %354 = vmatpush3.bf16.xpose.msra.mxu1 %v377_v25 }
  0x42   :  { %336 = vmatmul.mubr.msk.bf16.vlgmr.msra.gmra.mrb[0].mxu0 %vm86_vm0, %v22_v24 }
 0x115   :  { %v148_v27 = vpop.f32.mrb[0].mxu0 }
 0x116   :  { %v149_v28 = vadd.f32 %v282_v26, %v148_v27  ;;  %v337_v29 = vpop.f32.mrb[1].mxu0 }
 0x117   :  { %v151_v30 = vpop.f32.mrb[2].mxu0 }
 0x118   :  { %v154_v31 = vmax.f32 %v149_v28, 0.0  ;;  %v338_v32 = vpop.f32.mrb[3].mxu0 }
 0x11a   :  { %v155_v33 = vpack.c.bf16 %v154_v31, %v154_v31 }
 0x11c   :  { %356 = vmatmul.mubr.bf16.vlgmr.msra.gmra.mrb[0].mxu1 %v155_v33 }
 0x1ef   :  { %v261_v35 = vpop.f32.mrb[0].mxu1 }
 0x1f0   :  { %v262_v36 = vadd.f32 %v292_v34, %v261_v35  ;;  %v357_v37 = vpop.f32.mrb[1].mxu1 }
 0x1f1   :  { %v264_v38 = vpop.f32.mrb[2].mxu1 }
 0x1f2   :  { %267 = vst [vmem:[#allocation2] sm:$0xff] %v262_v36  ;;  %v358_v39 = vpop.f32.mrb[3].mxu1 }
 0x1f3   :  { %389 = shalt.err (!%p386_p4)
}
 0x1f4   :  { %s390_s4 = scalar_lea.hbm %s518_s5, 128 }
 0x1f5   :  { %p391_p5 = scmp.ne.s32.totalorder %s518_s5, %s390_s4  ;;  %p394_p6 = scmp.lt.u32.totalorder %s390_s4, %s518_s5 }
 0x1f7   :  { %p396_p7 = pnand %p394_p6, %p391_p5 }
 0x1f9   :  { %399 = shalt.err (!%p396_p7)
}
 0x1fa   :  { %277 = dma.vmem_to_hbm [thread:$0]  %s275_s30, 128, %s518_s5, [#allocation3]  }
 0x1fb   :  { %400 = dma.done.wait [#allocation3], 128  }
 0x1fc   :  { %401 = vsyncadd [#allocation3], 4294967168 }
 0x1fd   :  { %281 = vsyncpa [#allocation3], 1 }

</bundles_post_ra>
